<compile_context>
chip_gen: v7x
topology: tpu7x:2x2x1
jax: 0.10.0
libtpu: 0.0.40
codegen_flags: <defaults>
</compile_context>

<pallas_src>
import functools

import jax
import jax.numpy as jnp
from jax import lax
from jax.experimental import pallas as pl
from jax.experimental.pallas import tpu as pltpu


def _round_up(x: int, m: int) -> int:
    return ((x + m - 1) // m) * m


def _vq_kernel(z_ref, cbT_ref, cbsq_ref, cb_ref, zq_ref, *, n_e: int, pack: int):
    """One tile of packed rows.

    z_ref    : (tm4, pack*e_dim)   pack consecutive tokens per 128-lane row
    cbT_ref  : (pack*e_dim, pack*n_e)  block-diagonal codebook^T (resident)
    cbsq_ref : (1, pack*n_e)           tiled ||e_j||^2            (resident)
    cb_ref   : (pack*n_e, pack*e_dim)  block-diagonal codebook    (resident)
    zq_ref   : (tm4, pack*e_dim)   packed quantized output (lane-dense store)
    """
    zp = z_ref[...].astype(jnp.float32)                      # (tm4, pack*e_dim)
    cbT = cbT_ref[...]                                       # f32
    cb_sq = cbsq_ref[...]                                    # (1, pack*n_e)
    cb = cb_ref[...]                                         # f32

    # cross[r, j*n_e + k] = <z_{pack*r + j}, e_k>   (single MXU matmul, K dense)
    cross = jnp.dot(zp, cbT, preferred_element_type=jnp.float32)

    # ||z||^2 is constant per row -> omitted (argmin unchanged).
    d = cb_sq - 2.0 * cross                                  # (tm4, pack*n_e)

    # Per-segment argmin (first occurrence on ties, like torch.argmin).
    # Segment slices are lane-aligned (multiples of n_e columns) -> no relayout.
    one_hot_parts = []
    for j in range(pack):
        dj = d[:, j * n_e:(j + 1) * n_e]                     # (tm4, n_e)
        colj = lax.broadcasted_iota(jnp.int32, dj.shape, 1)
        mnj = jnp.min(dj, axis=1, keepdims=True)
        idx_cand = jnp.where(dj == mnj, colj, n_e)           # non-min -> n_e
        min_idx = jnp.min(idx_cand, axis=1, keepdims=True)   # first argmin
        one_hot_parts.append((colj == min_idx).astype(jnp.float32))
    one_hot = (one_hot_parts[0] if pack == 1
               else jnp.concatenate(one_hot_parts, axis=1))  # (tm4, pack*n_e)

    # Packed quantized rows: one_hot @ block-diag codebook (MXU), 128-lane store.
    zq = jnp.dot(one_hot, cb, preferred_element_type=jnp.float32)
    zq_ref[...] = zq.astype(zq_ref.dtype)


def _quantize_rows(z_flat, codebook, *, tm: int = 1024):
    """Nearest-codebook-entry lookup for a (N, e_dim) slab of tokens."""
    N, e_dim = z_flat.shape
    n_e, e_dim_cb = codebook.shape
    assert e_dim == e_dim_cb, "token dim must equal embedding dim"

    # Lane-dense packing factor: pack tokens so pack*e_dim is a multiple of 128.
    if e_dim < 128 and 128 % e_dim == 0:
        pack = 128 // e_dim
    else:
        # TODO(synk): e_dim that does not divide 128 (and is not a multiple of
        # 128) falls back to the lane-sparse layout; still correct.
        pack = 1

    cb32 = codebook.astype(jnp.float32)
    if pack > 1:
        eye = jnp.eye(pack, dtype=jnp.float32)
        cbT_blk = jnp.kron(eye, cb32.T)          # (pack*e_dim, pack*n_e)
        cb_blk = jnp.kron(eye, cb32)             # (pack*n_e, pack*e_dim)
    else:
        cbT_blk = cb32.T
        cb_blk = cb32
    cb_sq = jnp.sum(cb32 * cb32, axis=1)[None, :]            # (1, n_e)
    cb_sq_t = jnp.tile(cb_sq, (1, pack))                     # (1, pack*n_e)

    # Tile / padding bookkeeping: tm multiple of 8*pack, N padded to tile mult.
    row_quant = 8 * pack
    tm_req = max(row_quant, (tm // row_quant) * row_quant)
    n_pad_min = _round_up(N, row_quant)
    tm_eff = min(tm_req, n_pad_min)
    n_pad = _round_up(N, tm_eff)

    zf = z_flat
    if n_pad != N:
        zf = jnp.pad(zf, ((0, n_pad - N), (0, 0)))           # padded rows ignored
    z_packed = zf.reshape(n_pad // pack, pack * e_dim)       # free row-major view

    tm4 = tm_eff // pack
    grid = n_pad // tm_eff
    ed_p = pack * e_dim
    ne_p = pack * n_e

    kernel = functools.partial(_vq_kernel, n_e=n_e, pack=pack)

    cost = pl.CostEstimate(
        flops=4 * n_pad * n_e * e_dim,          # two logical matmuls
        transcendentals=0,
        bytes_accessed=2 * n_pad * e_dim * 4 + (2 * ne_p * ed_p + ne_p) * 4,
    )

    zq_packed = pl.pallas_call(
        kernel,
        out_shape=jax.ShapeDtypeStruct((n_pad // pack, ed_p), z_flat.dtype),
        grid_spec=pltpu.PrefetchScalarGridSpec(
            num_scalar_prefetch=0,
            grid=(grid,),
            in_specs=[
                # streamed token tiles (lane-dense, double-buffered by Pallas)
                pl.BlockSpec((tm4, ed_p), lambda i: (i, 0)),
                # codebook blocks: constant block index -> fetched once, resident
                pl.BlockSpec((ed_p, ne_p), lambda i: (0, 0)),
                pl.BlockSpec((1, ne_p), lambda i: (0, 0)),
                pl.BlockSpec((ne_p, ed_p), lambda i: (0, 0)),
            ],
            out_specs=pl.BlockSpec((tm4, ed_p), lambda i: (i, 0)),
        ),
        compiler_params=pltpu.CompilerParams(
            dimension_semantics=("parallel",)),
        cost_estimate=cost,
    )(z_packed, cbT_blk, cb_sq_t, cb_blk)

    return zq_packed.reshape(n_pad, e_dim)[:N]


def vector_quantizer_forward_nhwc(z_nhwc, codebook, *, tm: int = 1024):
    """Preferred entry point: channels-last, no extra HBM transposes."""
    B, H, W, C = z_nhwc.shape
    zq = _quantize_rows(z_nhwc.reshape(-1, C), codebook, tm=tm)
    zq = zq.reshape(B, H, W, C)
    # straight-through estimator: forward value == z_q
    return z_nhwc + lax.stop_gradient(zq - z_nhwc)


def vector_quantizer_forward(z_nchw, codebook, *, tm: int = 1024):
    """NCHW wrapper matching the PyTorch module interface.

    # TODO(synk): if the producer/consumer can operate channels-last, call
    # vector_quantizer_forward_nhwc directly and skip these two transposes.
    """
    B, C, H, W = z_nchw.shape
    n_e, e_dim = codebook.shape
    assert C == e_dim, "channel dim must equal embedding dim"
    z_nhwc = jnp.transpose(z_nchw, (0, 2, 3, 1))
    out_nhwc = vector_quantizer_forward_nhwc(z_nhwc, codebook, tm=tm)
    return jnp.transpose(out_nhwc, (0, 3, 1, 2))


def _reference_forward(z_nchw, codebook):
    """Pure-JAX reference of the PyTorch forward for correctness checking."""
    B, C, H, W = z_nchw.shape
    z = jnp.transpose(z_nchw, (0, 2, 3, 1)).reshape(-1, C)
    d = (jnp.sum(z ** 2, axis=1, keepdims=True)
         + jnp.sum(codebook ** 2, axis=1)
         - 2.0 * z @ codebook.T)
    idx = jnp.argmin(d, axis=1)
    zq = codebook[idx].reshape(B, H, W, C)
    return jnp.transpose(zq, (0, 3, 1, 2))


if __name__ == "__main__":
    n_e, e_dim = 128, 32

    key = jax.random.PRNGKey(0)
    k_emb, k_z1, k_z2 = jax.random.split(key, 3)

    # nn.Embedding(n_e, e_dim).weight ~ Uniform(-1/n_e, 1/n_e)
    codebook = jax.random.uniform(
        k_emb, (n_e, e_dim), dtype=jnp.float32,
        minval=-1.0 / n_e, maxval=1.0 / n_e)

    # Case 1: small, tile-divisible problem.
    B, H, W = 2, 8, 8
    z = jax.random.normal(k_z1, (B, e_dim, H, W), dtype=jnp.float32)
    z_q = jax.block_until_ready(vector_quantizer_forward(z, codebook))
    ref = _reference_forward(z, codebook)
    assert z_q.shape == (B, e_dim, H, W)
    assert jnp.allclose(z_q, ref, atol=1e-5, rtol=1e-5)

    # Case 2: non-divisible token count exercises the pad-and-slice path
    # (replaces the old `tm = N` fallback that risked VMEM OOM on v7x).
    B2, H2, W2 = 1, 10, 10
    z2 = jax.random.normal(k_z2, (B2, e_dim, H2, W2), dtype=jnp.float32)
    z_q2 = jax.block_until_ready(vector_quantizer_forward(z2, codebook))
    ref2 = _reference_forward(z2, codebook)
    assert z_q2.shape == (B2, e_dim, H2, W2)
    assert jnp.allclose(z_q2, ref2, atol=1e-5, rtol=1e-5)

    print("KERNEL_OK")
</pallas_src>

<mosaic_0001>
module attributes {stable_mosaic.version = 11 : i64} {
  func.func @_vq_kernel(%arg0: i32, %arg1: memref<32x128xf32, #tpu.memory_space<vmem>>, %arg2: memref<128x512xf32, #tpu.memory_space<vmem>>, %arg3: memref<1x512xf32, #tpu.memory_space<vmem>>, %arg4: memref<512x128xf32, #tpu.memory_space<vmem>>, %arg5: memref<32x128xf32, #tpu.memory_space<vmem>>) attributes {dimension_semantics = [#tpu.dimension_semantics<parallel>], iteration_bounds = array<i64: 1>, scalar_prefetch = 0 : i64, scratch_operands = 0 : i64, tpu.core_type = #tpu.core_type<tc>, window_params = [{transform_indices = @transform_0, window_bounds = array<i64: 32, 128>}, {pipeline_mode = #tpu.pipeline_mode<synchronous>, transform_indices = @transform_1, window_bounds = array<i64: 128, 512>}, {pipeline_mode = #tpu.pipeline_mode<synchronous>, transform_indices = @transform_2, window_bounds = array<i64: 1, 512>}, {pipeline_mode = #tpu.pipeline_mode<synchronous>, transform_indices = @transform_3, window_bounds = array<i64: 512, 128>}, {transform_indices = @transform_4, window_bounds = array<i64: 32, 128>}]} {
    %c0 = arith.constant 0 : index
    %c0_0 = arith.constant 0 : index
    %0 = vector.load %arg1[%c0, %c0_0] : memref<32x128xf32, #tpu.memory_space<vmem>>, vector<32x128xf32>
    %c0_1 = arith.constant 0 : index
    %c0_2 = arith.constant 0 : index
    %1 = vector.load %arg2[%c0_1, %c0_2] : memref<128x512xf32, #tpu.memory_space<vmem>>, vector<128x512xf32>
    %c0_3 = arith.constant 0 : index
    %c0_4 = arith.constant 0 : index
    %2 = vector.load %arg3[%c0_3, %c0_4] : memref<1x512xf32, #tpu.memory_space<vmem>>, vector<1x512xf32>
    %c0_5 = arith.constant 0 : index
    %c0_6 = arith.constant 0 : index
    %3 = vector.load %arg4[%c0_5, %c0_6] : memref<512x128xf32, #tpu.memory_space<vmem>>, vector<512x128xf32>
    %cst = arith.constant dense<0.000000e+00> : vector<32x512xf32>
    %4 = tpu.matmul %0, %1, %cst {dimension_numbers = #tpu.dot_dimension_numbers<[1], [0], [0], [1], [0, 0, 1, 1], [], []>} : vector<32x128xf32>, vector<128x512xf32>, vector<32x512xf32> -> vector<32x512xf32>
    %cst_7 = arith.constant 2.000000e+00 : f32
    %5 = vector.broadcast %cst_7 : f32 to vector<32x512xf32>
    %6 = arith.mulf %5, %4 : vector<32x512xf32>
    %7 = vector.broadcast %2 : vector<1x512xf32> to vector<32x512xf32>
    %8 = arith.subf %7, %6 : vector<32x512xf32>
    %9 = vector.extract_strided_slice %8 {offsets = [0, 0], sizes = [32, 128], strides = [1, 1]} : vector<32x512xf32> to vector<32x128xf32>
    %10 = tpu.iota {dimensions = array<i32: 1>} : vector<32x128xi32>
    %cst_8 = arith.constant dense<0x7F800000> : vector<32xf32>
    %11 = vector.multi_reduction <minimumf>, %9, %cst_8 [1] : vector<32x128xf32> to vector<32xf32>
    %12 = vector.shape_cast %11 : vector<32xf32> to vector<32x1xf32>
    %13 = vector.broadcast %12 : vector<32x1xf32> to vector<32x128xf32>
    %14 = arith.cmpf oeq, %9, %13 : vector<32x128xf32>
    %c128_i32 = arith.constant 128 : i32
    %15 = vector.broadcast %c128_i32 : i32 to vector<32x128xi32>
    %16 = arith.select %14, %10, %15 : vector<32x128xi1>, vector<32x128xi32>
    %cst_9 = arith.constant dense<2147483647> : vector<32xi32>
    %17 = vector.multi_reduction <minsi>, %16, %cst_9 [1] : vector<32x128xi32> to vector<32xi32>
    %18 = vector.shape_cast %17 : vector<32xi32> to vector<32x1xi32>
    %19 = vector.broadcast %18 : vector<32x1xi32> to vector<32x128xi32>
    %20 = arith.cmpi eq, %10, %19 : vector<32x128xi32>
    %21 = arith.extui %20 : vector<32x128xi1> to vector<32x128xi32>
    %22 = arith.sitofp %21 : vector<32x128xi32> to vector<32x128xf32>
    %23 = vector.extract_strided_slice %8 {offsets = [0, 128], sizes = [32, 128], strides = [1, 1]} : vector<32x512xf32> to vector<32x128xf32>
    %24 = tpu.iota {dimensions = array<i32: 1>} : vector<32x128xi32>
    %cst_10 = arith.constant dense<0x7F800000> : vector<32xf32>
    %25 = vector.multi_reduction <minimumf>, %23, %cst_10 [1] : vector<32x128xf32> to vector<32xf32>
    %26 = vector.shape_cast %25 : vector<32xf32> to vector<32x1xf32>
    %27 = vector.broadcast %26 : vector<32x1xf32> to vector<32x128xf32>
    %28 = arith.cmpf oeq, %23, %27 : vector<32x128xf32>
    %c128_i32_11 = arith.constant 128 : i32
    %29 = vector.broadcast %c128_i32_11 : i32 to vector<32x128xi32>
    %30 = arith.select %28, %24, %29 : vector<32x128xi1>, vector<32x128xi32>
    %cst_12 = arith.constant dense<2147483647> : vector<32xi32>
    %31 = vector.multi_reduction <minsi>, %30, %cst_12 [1] : vector<32x128xi32> to vector<32xi32>
    %32 = vector.shape_cast %31 : vector<32xi32> to vector<32x1xi32>
    %33 = vector.broadcast %32 : vector<32x1xi32> to vector<32x128xi32>
    %34 = arith.cmpi eq, %24, %33 : vector<32x128xi32>
    %35 = arith.extui %34 : vector<32x128xi1> to vector<32x128xi32>
    %36 = arith.sitofp %35 : vector<32x128xi32> to vector<32x128xf32>
    %37 = vector.extract_strided_slice %8 {offsets = [0, 256], sizes = [32, 128], strides = [1, 1]} : vector<32x512xf32> to vector<32x128xf32>
    %38 = tpu.iota {dimensions = array<i32: 1>} : vector<32x128xi32>
    %cst_13 = arith.constant dense<0x7F800000> : vector<32xf32>
    %39 = vector.multi_reduction <minimumf>, %37, %cst_13 [1] : vector<32x128xf32> to vector<32xf32>
    %40 = vector.shape_cast %39 : vector<32xf32> to vector<32x1xf32>
    %41 = vector.broadcast %40 : vector<32x1xf32> to vector<32x128xf32>
    %42 = arith.cmpf oeq, %37, %41 : vector<32x128xf32>
    %c128_i32_14 = arith.constant 128 : i32
    %43 = vector.broadcast %c128_i32_14 : i32 to vector<32x128xi32>
    %44 = arith.select %42, %38, %43 : vector<32x128xi1>, vector<32x128xi32>
    %cst_15 = arith.constant dense<2147483647> : vector<32xi32>
    %45 = vector.multi_reduction <minsi>, %44, %cst_15 [1] : vector<32x128xi32> to vector<32xi32>
    %46 = vector.shape_cast %45 : vector<32xi32> to vector<32x1xi32>
    %47 = vector.broadcast %46 : vector<32x1xi32> to vector<32x128xi32>
    %48 = arith.cmpi eq, %38, %47 : vector<32x128xi32>
    %49 = arith.extui %48 : vector<32x128xi1> to vector<32x128xi32>
    %50 = arith.sitofp %49 : vector<32x128xi32> to vector<32x128xf32>
    %51 = vector.extract_strided_slice %8 {offsets = [0, 384], sizes = [32, 128], strides = [1, 1]} : vector<32x512xf32> to vector<32x128xf32>
    %52 = tpu.iota {dimensions = array<i32: 1>} : vector<32x128xi32>
    %cst_16 = arith.constant dense<0x7F800000> : vector<32xf32>
    %53 = vector.multi_reduction <minimumf>, %51, %cst_16 [1] : vector<32x128xf32> to vector<32xf32>
    %54 = vector.shape_cast %53 : vector<32xf32> to vector<32x1xf32>
    %55 = vector.broadcast %54 : vector<32x1xf32> to vector<32x128xf32>
    %56 = arith.cmpf oeq, %51, %55 : vector<32x128xf32>
    %c128_i32_17 = arith.constant 128 : i32
    %57 = vector.broadcast %c128_i32_17 : i32 to vector<32x128xi32>
    %58 = arith.select %56, %52, %57 : vector<32x128xi1>, vector<32x128xi32>
    %cst_18 = arith.constant dense<2147483647> : vector<32xi32>
    %59 = vector.multi_reduction <minsi>, %58, %cst_18 [1] : vector<32x128xi32> to vector<32xi32>
    %60 = vector.shape_cast %59 : vector<32xi32> to vector<32x1xi32>
    %61 = vector.broadcast %60 : vector<32x1xi32> to vector<32x128xi32>
    %62 = arith.cmpi eq, %52, %61 : vector<32x128xi32>
    %63 = arith.extui %62 : vector<32x128xi1> to vector<32x128xi32>
    %64 = arith.sitofp %63 : vector<32x128xi32> to vector<32x128xf32>
    %65 = tpu.concatenate %22, %36, %50, %64 in 1 : vector<32x128xf32>, vector<32x128xf32>, vector<32x128xf32>, vector<32x128xf32> -> vector<32x512xf32>
    %cst_19 = arith.constant dense<0.000000e+00> : vector<32x128xf32>
    %66 = tpu.matmul %65, %3, %cst_19 {dimension_numbers = #tpu.dot_dimension_numbers<[1], [0], [0], [1], [0, 0, 1, 1], [], []>} : vector<32x512xf32>, vector<512x128xf32>, vector<32x128xf32> -> vector<32x128xf32>
    %c0_20 = arith.constant 0 : index
    %c0_21 = arith.constant 0 : index
    %67 = vector.load %arg5[%c0_20, %c0_21] : memref<32x128xf32, #tpu.memory_space<vmem>>, vector<32x128xf32>
    tpu.vector_store %arg5[%c0_20, %c0_21], %66 {strides = array<i32>} : memref<32x128xf32, #tpu.memory_space<vmem>>, vector<32x128xf32>,
    return
  }
  func.func @transform_0(%arg0: i32) -> (i32, i32) {
    %c0_i32 = arith.constant 0 : i32
    %c0_i32_0 = arith.constant 0 : i32
    return %arg0, %c0_i32 : i32, i32
  }
  func.func @transform_1(%arg0: i32) -> (i32, i32) {
    %c0_i32 = arith.constant 0 : i32
    %c0_i32_0 = arith.constant 0 : i32
    %c0_i32_1 = arith.constant 0 : i32
    return %c0_i32, %c0_i32_0 : i32, i32
  }
  func.func @transform_2(%arg0: i32) -> (i32, i32) {
    %c0_i32 = arith.constant 0 : i32
    %c0_i32_0 = arith.constant 0 : i32
    %c0_i32_1 = arith.constant 0 : i32
    return %c0_i32, %c0_i32_0 : i32, i32
  }
  func.func @transform_3(%arg0: i32) -> (i32, i32) {
    %c0_i32 = arith.constant 0 : i32
    %c0_i32_0 = arith.constant 0 : i32
    %c0_i32_1 = arith.constant 0 : i32
    return %c0_i32, %c0_i32_0 : i32, i32
  }
  func.func @transform_4(%arg0: i32) -> (i32, i32) {
    %c0_i32 = arith.constant 0 : i32
    %c0_i32_0 = arith.constant 0 : i32
    return %arg0, %c0_i32 : i32, i32
  }
}

</mosaic_0001>

<bundles_post_ra>
// kernel: tpu_custom_call.1
= control target key start
LH: loop header
LB: loop body
LE: loop exit
PB: predicated region body
PF: predicated region fallthrough
CT: control target
= control target key end

     0   :  { %9 = vsyncpa [#allocation3], 0  ;;  %s1714_s0 = inlined_call_operand.hbm [shape: f32[32,128], index: 0, kind: input, shape index: {}]   ;;  %s1715_s1 = inlined_call_operand.hbm [shape: f32[128,512], index: 1, kind: input, shape index: {}]   ;;  %s1716_s2 = inlined_call_operand.vmem [shape: f32[1,512], index: 2, kind: input, shape index: {}]   ;;  %s1717_s3 = inlined_call_operand.hbm [shape: f32[512,128], index: 3, kind: input, shape index: {}]   ;;  %s1718_s4 = inlined_call_operand.hbm [shape: f32[32,128], index: 4, kind: output, shape index: {}]  }
   0x1   :  { %10 = vsyncpa [#allocation6], 0 }
   0x2   :  { %11 = vsyncpa [#allocation4], 0  ;;  %s1305_s15 = smov [#allocation5]   ;;  %s1211_s19 = scalar_lea.hbm %s1715_s1, 8192 }
   0x3   :  { %s29_s16 = sshll.u32 %s1305_s15, 4  ;;  %p1212_p0 = scmp.ne.s32.totalorder %s1715_s1, %s1211_s19  ;;  %s30_s16 = int_to_ptr.vmem [resolvable:$true] %s29_s16 }
   0x4   :  { %p1215_p1 = scmp.lt.u32.totalorder %s1211_s19, %s1715_s1 }
   0x6   :  { %p1217_p2 = pnand %p1215_p1, %p1212_p0 }
   0x8   :  { %1220 = shalt.err (!%p1217_p2)
}
   0x9   :  { %s1221_s24 = scalar_lea.vmem %s30_s16, 8192  ;;  %p1226_p4 = scmp.lt.s32.totalorder %s30_s16, %s30_s16 }
   0xa   :  { %p1222_p3 = scmp.ne.s32.totalorder %s30_s16, %s1221_s24  ;;  %p1227_p5 = scmp.lt.s32.totalorder %s1221_s24, %s1221_s24 }
   0xc   :  { %p1228_p6 = por %p1227_p5, %p1226_p4 }
   0xe   :  { %p1229_p7 = pnand %p1228_p6, %p1222_p3 }
  0x10   :  { %1232 = shalt.err (!%p1229_p7)
}
  0x11   :  { %s1306_s25 = smov 512   ;;  %s1307_s26 = smov 32  }
  0x12   :  { %35 = dma.hbm_to_vmem [thread:$0]  %s1715_s1, 8192, %s30_s16, [#allocation6], %s1306_s25, %s1306_s25, %s1307_s26  }
  0x13   :  { %s1308_s29 = smov [#allocation2]   ;;  %s1233_s7 = scalar_lea.hbm %s1714_s0, 512 }
  0x14   :  { %s17_s30 = sshll.u32 %s1308_s29, 4  ;;  %p1234_p8 = scmp.ne.s32.totalorder %s1714_s0, %s1233_s7  ;;  %s18_s30 = int_to_ptr.vmem [resolvable:$true] %s17_s30 }
  0x15   :  { %p1237_p9 = scmp.lt.u32.totalorder %s1233_s7, %s1714_s0 }
  0x17   :  { %p1239_p10 = pnand %p1237_p9, %p1234_p8 }
  0x19   :  { %1242 = shalt.err (!%p1239_p10)
}
  0x1a   :  { %s1243_s12 = scalar_lea.vmem %s18_s30, 512  ;;  %p1248_p12 = scmp.lt.s32.totalorder %s18_s30, %s18_s30 }
  0x1b   :  { %p1244_p11 = scmp.ne.s32.totalorder %s18_s30, %s1243_s12  ;;  %p1249_p13 = scmp.lt.s32.totalorder %s1243_s12, %s1243_s12 }
  0x1d   :  { %p1250_p0 = por %p1249_p13, %p1248_p12 }
  0x1f   :  { %p1251_p1 = pnand %p1250_p0, %p1244_p11 }
  0x21   :  { %1254 = shalt.err (!%p1251_p1)
}
  0x22   :  { %s1309_s1 = smov 128   ;;  %s1310_s13 = smov 8  }
  0x23   :  { %23 = dma.hbm_to_vmem [thread:$0]  %s1714_s0, 512, %s18_s30, [#allocation3], %s1309_s1, %s1309_s1, %s1310_s13  }
  0x24   :  { %s1311_s16 = smov [#allocation7]   ;;  %s1255_s20 = scalar_lea.hbm %s1717_s3, 8192 }
  0x25   :  { %s43_s17 = sshll.u32 %s1311_s16, 4  ;;  %p1256_p2 = scmp.ne.s32.totalorder %s1717_s3, %s1255_s20  ;;  %s44_s17 = int_to_ptr.vmem [resolvable:$true] %s43_s17 }
  0x26   :  { %p1259_p3 = scmp.lt.u32.totalorder %s1255_s20, %s1717_s3 }
  0x28   :  { %p1261_p4 = pnand %p1259_p3, %p1256_p2 }
  0x2a   :  { %1264 = shalt.err (!%p1261_p4)
}
  0x2b   :  { %s1265_s25 = scalar_lea.vmem %s44_s17, 8192  ;;  %p1270_p6 = scmp.lt.s32.totalorder %s44_s17, %s44_s17 }
  0x2c   :  { %p1266_p5 = scmp.ne.s32.totalorder %s44_s17, %s1265_s25  ;;  %p1271_p7 = scmp.lt.s32.totalorder %s1265_s25, %s1265_s25 }
  0x2e   :  { %p1272_p8 = por %p1271_p7, %p1270_p6 }
  0x30   :  { %p1273_p9 = pnand %p1272_p8, %p1266_p5 }
  0x32   :  { %1276 = shalt.err (!%p1273_p9)
}
  0x33   :  { %49 = dma.hbm_to_vmem [thread:$0]  %s1717_s3, 8192, %s44_s17, [#allocation6], %s1309_s1, %s1309_s1, %s1310_s13  }
  0x34   :  { %1299 = dma.done.wait [#allocation3], 512  }
  0x35   :  { %1300 = vsyncadd [#allocation3], 4294966784 }
  0x36   :  { %1301 = dma.done.wait [#allocation6], 16384  }
  0x37   :  { %1302 = vsyncadd [#allocation6], 4294950912  ;;  %v1312_v0 = vmov 0.0   ;;  %v64_v1 = vld [vmem:[#allocation5 + $0x8] sm:$0xff]  ;;  %v63_v3 = vld [vmem:[#allocation5] sm:$0xff] }
  0x38   :  { %256 = vmatprep.mubr.f32.mxu0 %v1312_v0  ;;  %345 = vmatprep.mubr.f32.mxu1 %v1312_v0  ;;  %v68_v2 = vld [vmem:[#allocation5 + $0x28] sm:$0xff]  ;;  %v67_v5 = vld [vmem:[#allocation5 + $0x20] sm:$0xff]  ;;  %v66_v6 = vld [vmem:[#allocation5 + $0x18] sm:$0xff] }
  0x39   :  { %v1073_v4 = vpack.c.bf16 %v68_v2, %v64_v1  ;;  %v70_v7 = vld [vmem:[#allocation5 + $0x38] sm:$0xff]  ;;  %v1075_v8 = vpack.c.bf16 %v67_v5, %v63_v3  ;;  %v72_v10 = vld [vmem:[#allocation5 + $0x48] sm:$0xff]  ;;  %v65_v12 = vld [vmem:[#allocation5 + $0x10] sm:$0xff] }
  0x3a   :  { %v1105_v9 = vpack.c.bf16 %v70_v7, %v66_v6  ;;  %v76_v11 = vld [vmem:[#allocation5 + $0x68] sm:$0xff]  ;;  %v69_v14 = vld [vmem:[#allocation5 + $0x30] sm:$0xff]  ;;  %v71_v15 = vld [vmem:[#allocation5 + $0x40] sm:$0xff] }
  0x3b   :  { %1074 = vmatprep.subr.bf16.mxu0 %v1073_v4  ;;  %v1077_v13 = vpack.c.bf16 %v76_v11, %v72_v10  ;;  %v75_v16 = vld [vmem:[#allocation5 + $0x60] sm:$0xff]  ;;  %v1107_v17 = vpack.c.bf16 %v69_v14, %v65_v12  ;;  %v74_v19 = vld [vmem:[#allocation5 + $0x58] sm:$0xff]  ;;  %v80_v21 = vld [vmem:[#allocation5 + $0x88] sm:$0xff] }
  0x3c   :  { %1076 = vmatpush1.bf16.msra.mxu0 %v1075_v8  ;;  %1106 = vmatprep.subr.bf16.mxu1 %v1105_v9  ;;  %v1079_v18 = vpack.c.bf16 %v75_v16, %v71_v15  ;;  %v78_v20 = vld [vmem:[#allocation5 + $0x78] sm:$0xff]  ;;  %v84_v23 = vld [vmem:[#allocation5 + $0xa8] sm:$0xff]  ;;  %v73_v24 = vld [vmem:[#allocation5 + $0x50] sm:$0xff] }
  0x3d   :  { %1078 = vmatprep.subr.bf16.mxu0 %v1077_v13  ;;  %v1109_v22 = vpack.c.bf16 %v78_v20, %v74_v19  ;;  %v77_v25 = vld [vmem:[#allocation5 + $0x70] sm:$0xff]  ;;  %1108 = vmatpush1.bf16.msra.mxu1 %v1107_v17  ;;  %v1081_v26 = vpack.c.bf16 %v84_v23, %v80_v21  ;;  %v79_v28 = vld [vmem:[#allocation5 + $0x80] sm:$0xff]  ;;  %v82_v30 = vld [vmem:[#allocation5 + $0x98] sm:$0xff] }
  0x3e   :  { %v1111_v27 = vpack.c.bf16 %v77_v25, %v73_v24  ;;  %v83_v29 = vld [vmem:[#allocation5 + $0xa0] sm:$0xff]  ;;  %v86_v31 = vld [vmem:[#allocation5 + $0xb8] sm:$0xff]  ;;  %v88_v32 = vld [vmem:[#allocation5 + $0xc8] sm:$0xff] }
  0x3f   :  { %1110 = vmatprep.subr.bf16.mxu1 %v1109_v22  ;;  %v92_v33 = vld [vmem:[#allocation5 + $0xe8] sm:$0xff]  ;;  %v1083_v34 = vpack.c.bf16 %v83_v29, %v79_v28  ;;  %v1113_v35 = vpack.c.bf16 %v86_v31, %v82_v30  ;;  %v81_v36 = vld [vmem:[#allocation5 + $0x90] sm:$0xff]  ;;  %v87_v38 = vld [vmem:[#allocation5 + $0xc0] sm:$0xff] }
  0x40   :  { %1080 = vmatpush1.bf16.msra.mxu0 %v1079_v18  ;;  %v85_v37 = vld [vmem:[#allocation5 + $0xb0] sm:$0xff]  ;;  %v1085_v39 = vpack.c.bf16 %v92_v33, %v88_v32  ;;  %v91_v40 = vld [vmem:[#allocation5 + $0xe0] sm:$0xff]  ;;  %v90_v41 = vld [vmem:[#allocation5 + $0xd8] sm:$0xff] }
  0x41   :  { %1082 = vmatprep.subr.bf16.mxu0 %v1081_v26  ;;  %v94_v42 = vld [vmem:[#allocation5 + $0xf8] sm:$0xff]  ;;  %1112 = vmatpush1.bf16.msra.mxu1 %v1111_v27  ;;  %v1115_v43 = vpack.c.bf16 %v85_v37, %v81_v36  ;;  %v96_v44 = vld [vmem:[#allocation5 + $0x108] sm:$0xff]  ;;  %v89_v47 = vld [vmem:[#allocation5 + $0xd0] sm:$0xff]  ;;  %v1087_v49 = vpack.c.bf16 %v91_v40, %v87_v38  ;;  %v387_v38 = vlaneseq }
  0x42   :  { %v100_v45 = vld [vmem:[#allocation5 + $0x128] sm:$0xff]  ;;  %1114 = vmatprep.subr.bf16.mxu1 %v1113_v35  ;;  %v1117_v46 = vpack.c.bf16 %v94_v42, %v90_v41  ;;  %v93_v48 = vld [vmem:[#allocation5 + $0xf0] sm:$0xff]  ;;  %v98_v50 = vld [vmem:[#allocation5 + $0x118] sm:$0xff] }
  0x43   :  { %v102_v51 = vld [vmem:[#allocation5 + $0x138] sm:$0xff]  ;;  %v1089_v52 = vpack.c.bf16 %v100_v45, %v96_v44  ;;  %v95_v53 = vld [vmem:[#allocation5 + $0x100] sm:$0xff]  ;;  %v1119_v55 = vpack.c.bf16 %v93_v48, %v89_v47  ;;  %v104_v56 = vld [vmem:[#allocation5 + $0x148] sm:$0xff] }
  0x44   :  { %1084 = vmatpush1.bf16.msra.mxu0 %v1083_v34  ;;  %v99_v54 = vld [vmem:[#allocation5 + $0x120] sm:$0xff]  ;;  %v108_v57 = vld [vmem:[#allocation5 + $0x168] sm:$0xff]  ;;  %v1121_v58 = vpack.c.bf16 %v102_v51, %v98_v50  ;;  %v97_v59 = vld [vmem:[#allocation5 + $0x110] sm:$0xff] }
  0x45   :  { %1086 = vmatprep.subr.bf16.mxu0 %v1085_v39  ;;  %1116 = vmatpush1.bf16.msra.mxu1 %v1115_v43  ;;  %v101_v60 = vld [vmem:[#allocation5 + $0x130] sm:$0xff]  ;;  %v1091_v61 = vpack.c.bf16 %v99_v54, %v95_v53  ;;  %v106_v62 = vld [vmem:[#allocation5 + $0x158] sm:$0xff]  ;;  %v1093_v1 = vpack.c.bf16 %v108_v57, %v104_v56  ;;  %v103_v2 = vld [vmem:[#allocation5 + $0x140] sm:$0xff]  ;;  %v388_v39 = vshrl.u32 %v387_v38, 7 }
  0x46   :  { %1118 = vmatprep.subr.bf16.mxu1 %v1117_v46  ;;  %v110_v63 = vld [vmem:[#allocation5 + $0x178] sm:$0xff]  ;;  %v107_v3 = vld [vmem:[#allocation5 + $0x160] sm:$0xff]  ;;  %v1123_v4 = vpack.c.bf16 %v101_v60, %v97_v59  ;;  %v112_v5 = vld [vmem:[#allocation5 + $0x188] sm:$0xff] }
  0x47   :  { %v116_v6 = vld [vmem:[#allocation5 + $0x1a8] sm:$0xff]  ;;  %v1125_v7 = vpack.c.bf16 %v110_v63, %v106_v62  ;;  %v105_v8 = vld [vmem:[#allocation5 + $0x150] sm:$0xff]  ;;  %v1095_v10 = vpack.c.bf16 %v107_v3, %v103_v2  ;;  %v114_v11 = vld [vmem:[#allocation5 + $0x198] sm:$0xff]  ;;  %v389_v40 = vsub.s32 0, %v388_v39  ;;  %v393_v42 = vsub.s32 1, %v388_v39 }
  0x48   :  { %1088 = vmatpush1.bf16.msra.mxu0 %v1087_v49  ;;  %v109_v9 = vld [vmem:[#allocation5 + $0x170] sm:$0xff]  ;;  %v118_v12 = vld [vmem:[#allocation5 + $0x1b8] sm:$0xff]  ;;  %v1097_v13 = vpack.c.bf16 %v116_v6, %v112_v5  ;;  %v111_v14 = vld [vmem:[#allocation5 + $0x180] sm:$0xff]  ;;  %v397_v43 = vsub.s32 2, %v388_v39  ;;  %v401_v44 = vsub.s32 3, %v388_v39 }
  0x49   :  { %1090 = vmatprep.subr.bf16.mxu0 %v1089_v52  ;;  %1120 = vmatpush1.bf16.msra.mxu1 %v1119_v55  ;;  %v115_v15 = vld [vmem:[#allocation5 + $0x1a0] sm:$0xff]  ;;  %v1127_v16 = vpack.c.bf16 %v109_v9, %v105_v8  ;;  %v120_v17 = vld [vmem:[#allocation5 + $0x1c8] sm:$0xff]  ;;  %v1129_v19 = vpack.c.bf16 %v118_v12, %v114_v11  ;;  %v113_v20 = vld [vmem:[#allocation5 + $0x190] sm:$0xff] }
  0x4a   :  { %1122 = vmatprep.subr.bf16.mxu1 %v1121_v58  ;;  %v124_v18 = vld [vmem:[#allocation5 + $0x1e8] sm:$0xff]  ;;  %v117_v21 = vld [vmem:[#allocation5 + $0x1b0] sm:$0xff]  ;;  %v1099_v22 = vpack.c.bf16 %v115_v15, %v111_v14  ;;  %v122_v23 = vld [vmem:[#allocation5 + $0x1d8] sm:$0xff] }
  0x4b   :  { %v126_v24 = vld [vmem:[#allocation5 + $0x1f8] sm:$0xff]  ;;  %v1101_v25 = vpack.c.bf16 %v124_v18, %v120_v17  ;;  %v119_v26 = vld [vmem:[#allocation5 + $0x1c0] sm:$0xff]  ;;  %v1131_v28 = vpack.c.bf16 %v117_v21, %v113_v20  ;;  %v121_v30 = vld [vmem:[#allocation5 + $0x1d0] sm:$0xff] }
  0x4c   :  { %1092 = vmatpush1.bf16.msra.mxu0 %v1091_v61  ;;  %v123_v27 = vld [vmem:[#allocation5 + $0x1e0] sm:$0xff]  ;;  %v1133_v29 = vpack.c.bf16 %v126_v24, %v122_v23  ;;  %v125_v31 = vld [vmem:[#allocation5 + $0x1f0] sm:$0xff]  ;;  %v60_v35 = vld [vmem:[#allocation2 + $0x8] sm:$0xff] }
  0x4d   :  { %1094 = vmatprep.subr.bf16.mxu0 %v1093_v1  ;;  %1124 = vmatpush1.bf16.msra.mxu1 %v1123_v4  ;;  %v1103_v32 = vpack.c.bf16 %v123_v27, %v119_v26  ;;  %v1135_v33 = vpack.c.bf16 %v125_v31, %v121_v30  ;;  %v59_v34 = vld [vmem:[#allocation2] sm:$0xff]  ;;  %v61_v36 = vld [vmem:[#allocation2 + $0x10] sm:$0xff]  ;;  %v62_v37 = vld [vmem:[#allocation2 + $0x18] sm:$0xff] }
  0x4e   :  { %1126 = vmatprep.subr.bf16.mxu1 %v1125_v7  ;;  %v127_v41 = vld [vmem:[%s1716_s2] sm:$0xf]  ;;  %s1314_s2 = smov [#allocation8]  }
  0x4f   :  { %v1394_v45 = vrot.slane %v127_v41, %v389_v40  ;;  %v394_v47 = vrot.slane %v127_v41, %v393_v42  ;;  %v402_v52 = vrot.slane %v127_v41, %v401_v44  ;;  %s940_s28 = sshll.u32 %s1314_s2, 4  ;;  %s941_s28 = int_to_ptr.vmem [resolvable:$true] %s940_s28 }
  0x50   :  { %1096 = vmatpush1.bf16.msra.mxu0 %v1095_v10  ;;  %s1277_s29 = scalar_lea.vmem %s941_s28, 512  ;;  %p1282_p11 = scmp.lt.s32.totalorder %s941_s28, %s941_s28 }
  0x51   :  { %1098 = vmatprep.subr.bf16.mxu0 %v1097_v13  ;;  %1128 = vmatpush1.bf16.msra.mxu1 %v1127_v16  ;;  %p1278_p10 = scmp.ne.s32.totalorder %s941_s28, %s1277_s29  ;;  %p1283_p12 = scmp.lt.s32.totalorder %s1277_s29, %s1277_s29 }
  0x52   :  { %1130 = vmatprep.subr.bf16.mxu1 %v1129_v19 }
  0x53   :  { %p1284_p13 = por %p1283_p12, %p1282_p11 }
  0x54   :  { %1100 = vmatpush1.bf16.msra.mxu0 %v1099_v22 }
  0x55   :  { %1102 = vmatprep.subr.bf16.mxu0 %v1101_v25  ;;  %1132 = vmatpush1.bf16.msra.mxu1 %v1131_v28  ;;  %p1285_p0 = pnand %p1284_p13, %p1278_p10 }
  0x56   :  { %1134 = vmatprep.subr.bf16.mxu1 %v1133_v29 }
  0x58   :  { %1104 = vmatpush1.bf16.msra.mxu0 %v1103_v32 }
  0x59   :  { %1136 = vmatpush1.bf16.msra.mxu1 %v1135_v33  ;;  %v1443_v33 = vand.u32 127, %v387_v38 }
  0x5b   :  { %257 = vmatmul.mubr.f32.vlgmr.msra.gmra.mrb[0].mxu0 %v59_v34 }
  0x5c   :  { %262 = vmatprep.mubr.f32.mxu0 %v1312_v0  ;;  %346 = vmatmul.mubr.f32.vlgmr.msra.gmra.mrb[0].mxu1 %v59_v34 }
  0x5d   :  { %351 = vmatprep.mubr.f32.mxu1 %v1312_v0 }
  0x5f   :  { %263 = vmatmul.mubr.f32.gmra.mrb[2].mxu0 %v60_v35 }
  0x60   :  { %268 = vmatprep.mubr.f32.mxu0 %v1312_v0  ;;  %352 = vmatmul.mubr.f32.gmra.mrb[2].mxu1 %v60_v35 }
  0x61   :  { %357 = vmatprep.mubr.f32.mxu1 %v1312_v0 }
  0x63   :  { %269 = vmatmul.mubr.f32.gmra.mrb[4].mxu0 %v61_v36 }
  0x64   :  { %274 = vmatprep.mubr.f32.mxu0 %v1312_v0  ;;  %358 = vmatmul.mubr.f32.gmra.mrb[4].mxu1 %v61_v36 }
  0x65   :  { %363 = vmatprep.mubr.f32.mxu1 %v1312_v0  ;;  %v398_v0 = vrot.slane %v127_v41, %v397_v43 }
  0x67   :  { %275 = vmatmul.mubr.f32.gmra.mrb[6].mxu0 %v62_v37 }
  0x68   :  { %364 = vmatmul.mubr.f32.gmra.mrb[6].mxu1 %v62_v37 }
 0x12e   :  { %v258_v46 = vpop.f32.mrb[0].mxu0 }
 0x12f   :  { %v370_v48 = vmul.f32 2.0, %v258_v46  ;;  %v260_v49 = vpop.f32.mrb[1].mxu0  ;;  %v347_v51 = vpop.f32.mrb[0].mxu1 }
 0x130   :  { %v371_v50 = vmul.f32 2.0, %v260_v49  ;;  %v372_v53 = vmul.f32 2.0, %v347_v51  ;;  %v349_v54 = vpop.f32.mrb[1].mxu1 }
 0x131   :  { %v407_v55 = vsub.f32 %v1394_v45, %v370_v48  ;;  %v373_v56 = vmul.f32 2.0, %v349_v54 }
 0x132   :  { %v408_v57 = vsub.f32 %v394_v47, %v371_v50  ;;  %v264_v58 = vpop.f32.mrb[2].mxu0  ;;  %v1397_v59 = vsub.f32 %v398_v0, %v372_v53 }
 0x133   :  { %425 = vmin.xlane.f32.xlu1 %v407_v55  ;;  %v266_v60 = vpop.f32.mrb[3].mxu0  ;;  %v353_v61 = vpop.f32.mrb[2].mxu1  ;;  %v374_v62 = vmul.f32 2.0, %v264_v58  ;;  %v1399_v63 = vsub.f32 %v402_v52, %v373_v56 }
 0x134   :  { %509 = vmin.xlane.f32.xlu0 %v408_v57  ;;  %v376_v1 = vmul.f32 2.0, %v353_v61  ;;  %v355_v2 = vpop.f32.mrb[3].mxu1  ;;  %v375_v7 = vmul.f32 2.0, %v266_v60 }
 0x135   :  { %v377_v4 = vmul.f32 2.0, %v355_v2  ;;  %v1406_v8 = vsub.f32 %v1394_v45, %v374_v62 }
 0x136   :  { %v270_v3 = vpop.f32.mrb[4].mxu0  ;;  %v1402_v5 = vsub.f32 %v398_v0, %v376_v1  ;;  %v1412_v16 = vsub.f32 %v394_v47, %v375_v7 }
 0x137   :  { %593 = vmin.xlane.f32.xlu1 %v1397_v59  ;;  %v272_v6 = vpop.f32.mrb[5].mxu0  ;;  %v359_v9 = vpop.f32.mrb[4].mxu1  ;;  %v1409_v13 = vsub.f32 %v402_v52, %v377_v4  ;;  %v378_v15 = vmul.f32 2.0, %v270_v3 }
 0x138   :  { %677 = vmin.xlane.f32.xlu0 %v1399_v63  ;;  %v361_v10 = vpop.f32.mrb[5].mxu1  ;;  %v380_v12 = vmul.f32 2.0, %v359_v9  ;;  %v379_v21 = vmul.f32 2.0, %v272_v6 }
 0x139   :  { %v381_v19 = vmul.f32 2.0, %v361_v10  ;;  %v1419_v22 = vsub.f32 %v1394_v45, %v378_v15 }
 0x13a   :  { %v276_v11 = vpop.f32.mrb[6].mxu0  ;;  %v1415_v20 = vsub.f32 %v398_v0, %v380_v12  ;;  %v1425_v26 = vsub.f32 %v394_v47, %v379_v21 }
 0x13b   :  { %595 = vmin.xlane.f32.xlu1 %v1402_v5  ;;  %v278_v14 = vpop.f32.mrb[7].mxu0  ;;  %v365_v17 = vpop.f32.mrb[6].mxu1  ;;  %v1422_v24 = vsub.f32 %v402_v52, %v381_v19  ;;  %v382_v30 = vmul.f32 2.0, %v276_v11 }
 0x13c   :  { %427 = vmin.xlane.f32.xlu0 %v1406_v8  ;;  %v367_v18 = vpop.f32.mrb[7].mxu1  ;;  %v383_v25 = vmul.f32 2.0, %v278_v14  ;;  %v384_v27 = vmul.f32 2.0, %v365_v17 }
 0x13d   :  { %v385_v23 = vmul.f32 2.0, %v367_v18  ;;  %v1438_v32 = vsub.f32 %v1394_v45, %v382_v30 }
 0x13e   :  { %v1431_v29 = vsub.f32 %v394_v47, %v383_v25  ;;  %v1434_v31 = vsub.f32 %v398_v0, %v384_v27 }
 0x13f   :  { %679 = vmin.xlane.f32.xlu1 %v1409_v13  ;;  %v1428_v28 = vsub.f32 %v402_v52, %v385_v23 }
 0x140   :  { %511 = vmin.xlane.f32.xlu0 %v1412_v16 }
 0x143   :  { %597 = vmin.xlane.f32.xlu1 %v1415_v20 }
 0x144   :  { %429 = vmin.xlane.f32.xlu0 %v1419_v22 }
 0x147   :  { %681 = vmin.xlane.f32.xlu1 %v1422_v24 }
 0x148   :  { %513 = vmin.xlane.f32.xlu0 %v1425_v26 }
 0x14b   :  { %683 = vmin.xlane.f32.xlu1 %v1428_v28 }
 0x14c   :  { %515 = vmin.xlane.f32.xlu0 %v1431_v29 }
 0x14f   :  { %599 = vmin.xlane.f32.xlu1 %v1434_v31 }
 0x150   :  { %431 = vmin.xlane.f32.xlu0 %v1438_v32 }
 0x1c0   :  { %v426_v34 = vpop.xlane.xlu1 %425 }
 0x1c1   :  { %vm433_vm0 = vcmp.eq.f32.partialorder %v407_v55, %v426_v34  ;;  %v510_v35 = vpop.xlane.xlu0 %509 }
 0x1c2   :  { %v1446_v36 = vsel %vm433_vm0, %v1443_v33, 128  ;;  %vm517_vm1 = vcmp.eq.f32.partialorder %v408_v57, %v510_v35  ;;  %v144_v35 = vld [vmem:[#allocation7 + $0x80] sm:$0xff] }
 0x1c3   :  { %v1449_v37 = vsel %vm517_vm1, %v1443_v33, 128  ;;  %v442_v39 = vshra.s32 %v1446_v36, 16 }
 0x1c4   :  { %v594_v40 = vpop.xlane.xlu1 %593  ;;  %v526_v38 = vshra.s32 %v1449_v37, 16 }
 0x1c5   :  { %vm601_vm2 = vcmp.eq.f32.partialorder %v1397_v59, %v594_v40  ;;  %v678_v41 = vpop.xlane.xlu0 %677  ;;  %v1453_v42 = vcvt.s32.f32 %v442_v39  ;;  %v145_v39 = vld [vmem:[#allocation7 + $0x88] sm:$0xff]  ;;  %v128_v40 = vld [vmem:[#allocation7] sm:$0xff] }
 0x1c6   :  { %v1457_v43 = vsel %vm601_vm2, %v1443_v33, 128  ;;  %vm685_vm3 = vcmp.eq.f32.partialorder %v1399_v63, %v678_v41  ;;  %v1468_v49 = vcvt.s32.f32 %v526_v38  ;;  %v1137_v41 = vpack.c.bf16 %v145_v39, %v144_v35  ;;  %v129_v38 = vld [vmem:[#allocation7 + $0x8] sm:$0xff]  ;;  %v180_v35 = vld [vmem:[#allocation7 + $0x1a0] sm:$0xff] }
 0x1c7   :  { %v1461_v44 = vsel %vm685_vm3, %v1443_v33, 128  ;;  %445 = vmin.xlane.f32.xlu0 %v1453_v42  ;;  %v610_v45 = vshra.s32 %v1457_v43, 16  ;;  %v181_v39 = vld [vmem:[#allocation7 + $0x1a8] sm:$0xff] }
 0x1c8   :  { %v596_v46 = vpop.xlane.xlu1 %595  ;;  %v694_v0 = vshra.s32 %v1461_v44, 16  ;;  %1138 = vmatprep.subr.bf16.mxu0 %v1137_v41  ;;  %v1177_v41 = vpack.c.bf16 %v181_v39, %v180_v35  ;;  %v138_v35 = vld [vmem:[#allocation7 + $0x50] sm:$0xff]  ;;  %v139_v39 = vld [vmem:[#allocation7 + $0x58] sm:$0xff] }
 0x1c9   :  { %vm602_vm4 = vcmp.eq.f32.partialorder %v1402_v5, %v596_v46  ;;  %v428_v47 = vpop.xlane.xlu0 %427  ;;  %v1466_v48 = vcvt.s32.f32 %v610_v45  ;;  %v146_v45 = vld [vmem:[#allocation7 + $0x90] sm:$0xff]  ;;  %v147_v46 = vld [vmem:[#allocation7 + $0x98] sm:$0xff] }
 0x1ca   :  { %v1472_v50 = vsel %vm602_vm4, %v1443_v33, 128  ;;  %vm434_vm5 = vcmp.eq.f32.partialorder %v1406_v8, %v428_v47  ;;  %v1482_v55 = vcvt.s32.f32 %v694_v0  ;;  %v1139_v47 = vpack.c.bf16 %v129_v38, %v128_v40  ;;  %v134_v38 = vld [vmem:[#allocation7 + $0x30] sm:$0xff] }
 0x1cb   :  { %v1476_v51 = vsel %vm434_vm5, %v1443_v33, 128  ;;  %613 = vmin.xlane.f32.xlu1 %v1466_v48  ;;  %529 = vmin.xlane.f32.xlu0 %v1468_v49  ;;  %v624_v56 = vshra.s32 %v1472_v50, 16  ;;  %v1141_v0 = vpack.c.bf16 %v147_v46, %v146_v45  ;;  %v164_v45 = vld [vmem:[#allocation7 + $0x120] sm:$0xff] }
 0x1cc   :  { %v680_v52 = vpop.xlane.xlu1 %679  ;;  %v456_v53 = vshra.s32 %v1476_v51, 16  ;;  %1140 = vmatpush3.bf16.msra.mxu0 %v1139_v47  ;;  %v135_v47 = vld [vmem:[#allocation7 + $0x38] sm:$0xff] }
 0x1cd   :  { %vm686_vm6 = vcmp.eq.f32.partialorder %v1409_v13, %v680_v52  ;;  %v512_v54 = vpop.xlane.xlu0 %511  ;;  %v1498_v63 = vcvt.s32.f32 %v624_v56  ;;  %v176_v52 = vld [vmem:[#allocation7 + $0x180] sm:$0xff]  ;;  %1142 = vmatprep.subr.bf16.mxu0 %v1141_v0  ;;  %v165_v0 = vld [vmem:[#allocation7 + $0x128] sm:$0xff] }
 0x1ce   :  { %v1486_v57 = vsel %vm686_vm6, %v1443_v33, 128  ;;  %vm518_vm7 = vcmp.eq.f32.partialorder %v1412_v16, %v512_v54  ;;  %v1489_v58 = vcvt.s32.f32 %v456_v53  ;;  %v177_v53 = vld [vmem:[#allocation7 + $0x188] sm:$0xff]  ;;  %v130_v54 = vld [vmem:[#allocation7 + $0x10] sm:$0xff] }
 0x1cf   :  { %v1492_v59 = vsel %vm518_vm7, %v1443_v33, 128  ;;  %697 = vmin.xlane.f32.xlu1 %v1482_v55  ;;  %v708_v1 = vshra.s32 %v1486_v57, 16  ;;  %v1169_v56 = vpack.c.bf16 %v177_v53, %v176_v52  ;;  %v152_v52 = vld [vmem:[#allocation7 + $0xc0] sm:$0xff]  ;;  %v1179_v53 = vpack.c.bf16 %v165_v0, %v164_v45 }
 0x1d0   :  { %v598_v60 = vpop.xlane.xlu1 %597  ;;  %459 = vmin.xlane.f32.xlu0 %v1489_v58  ;;  %v540_v61 = vshra.s32 %v1492_v59, 16  ;;  %v525_v45 = vand.u32 65535, %v1449_v37  ;;  %v455_v37 = vand.u32 65535, %v1476_v51 }
 0x1d1   :  { %vm603_vm8 = vcmp.eq.f32.partialorder %v1415_v20, %v598_v60  ;;  %v430_v62 = vpop.xlane.xlu0 %429  ;;  %v1514_v8 = vcvt.s32.f32 %v708_v1  ;;  %v131_v60 = vld [vmem:[#allocation7 + $0x18] sm:$0xff]  ;;  %1170 = vmatprep.subr.bf16.mxu1 %v1169_v56  ;;  %v182_v56 = vld [vmem:[#allocation7 + $0x1b0] sm:$0xff] }
 0x1d2   :  { %v1502_v2 = vsel %vm603_vm8, %v1443_v33, 128  ;;  %vm435_vm9 = vcmp.eq.f32.partialorder %v1419_v22, %v430_v62  ;;  %v1505_v3 = vcvt.s32.f32 %v540_v61  ;;  %v160_v61 = vld [vmem:[#allocation7 + $0x100] sm:$0xff]  ;;  %v161_v62 = vld [vmem:[#allocation7 + $0x108] sm:$0xff]  ;;  %v1143_v1 = vpack.c.bf16 %v131_v60, %v130_v54  ;;  %v183_v60 = vld [vmem:[#allocation7 + $0x1b8] sm:$0xff] }
 0x1d3   :  { %v1508_v4 = vsel %vm435_vm9, %v1443_v33, 128  ;;  %627 = vmin.xlane.f32.xlu1 %v1498_v63  ;;  %v638_v9 = vshra.s32 %v1502_v2, 16  ;;  %v153_v54 = vld [vmem:[#allocation7 + $0xc8] sm:$0xff] }
 0x1d4   :  { %v682_v5 = vpop.xlane.xlu1 %681  ;;  %543 = vmin.xlane.f32.xlu0 %v1505_v3  ;;  %v470_v6 = vshra.s32 %v1508_v4, 16  ;;  %1144 = vmatpush3.bf16.msra.mxu0 %v1143_v1  ;;  %v1151_v1 = vpack.c.bf16 %v135_v47, %v134_v38  ;;  %v441_v38 = vand.u32 65535, %v1446_v36  ;;  %v527_v36 = vcvt.s32.f32 %v525_v45 }
 0x1d5   :  { %vm687_vm10 = vcmp.eq.f32.partialorder %v1422_v24, %v682_v5  ;;  %v514_v7 = vpop.xlane.xlu0 %513  ;;  %v1530_v16 = vcvt.s32.f32 %v638_v9  ;;  %v1171_v5 = vpack.c.bf16 %v161_v62, %v160_v61  ;;  %v178_v9 = vld [vmem:[#allocation7 + $0x190] sm:$0xff]  ;;  %v1181_v61 = vpack.c.bf16 %v183_v60, %v182_v56 }
 0x1d6   :  { %v1518_v10 = vsel %vm687_vm10, %v1443_v33, 128  ;;  %vm519_vm11 = vcmp.eq.f32.partialorder %v1425_v26, %v514_v7  ;;  %v1521_v11 = vcvt.s32.f32 %v470_v6  ;;  %v148_v6 = vld [vmem:[#allocation7 + $0xa0] sm:$0xff]  ;;  %v149_v7 = vld [vmem:[#allocation7 + $0xa8] sm:$0xff]  ;;  %v166_v62 = vld [vmem:[#allocation7 + $0x130] sm:$0xff]  ;;  %v443_v0 = vcvt.s32.f32 %v441_v38 }
 0x1d7   :  { %v1524_v12 = vsel %vm519_vm11, %v1443_v33, 128  ;;  %711 = vmin.xlane.f32.xlu1 %v1514_v8  ;;  %v722_v17 = vshra.s32 %v1518_v10, 16  ;;  %1172 = vmatpush3.bf16.msra.mxu1 %v1171_v5  ;;  %v167_v5 = vld [vmem:[#allocation7 + $0x138] sm:$0xff]  ;;  %v721_v45 = vand.u32 65535, %v1518_v10  ;;  %v189_v10 = vld [vmem:[#allocation7 + $0x1e8] sm:$0xff] }
 0x1d8   :  { %v684_v13 = vpop.xlane.xlu1 %683  ;;  %473 = vmin.xlane.f32.xlu0 %v1521_v11  ;;  %v554_v14 = vshra.s32 %v1524_v12, 16 }
 0x1d9   :  { %vm688_vm12 = vcmp.eq.f32.partialorder %v1428_v28, %v684_v13  ;;  %v516_v15 = vpop.xlane.xlu0 %515  ;;  %v1546_v24 = vcvt.s32.f32 %v722_v17  ;;  %v1145_v13 = vpack.c.bf16 %v149_v7, %v148_v6  ;;  %v133_v17 = vld [vmem:[#allocation7 + $0x28] sm:$0xff]  ;;  %v184_v6 = vld [vmem:[#allocation7 + $0x1c0] sm:$0xff]  ;;  %v1153_v7 = vpack.c.bf16 %v153_v54, %v152_v52 }
 0x1da   :  { %v1534_v18 = vsel %vm688_vm12, %v1443_v33, 128  ;;  %vm520_vm13 = vcmp.eq.f32.partialorder %v1431_v29, %v516_v15  ;;  %v1537_v19 = vcvt.s32.f32 %v554_v14  ;;  %v179_v14 = vld [vmem:[#allocation7 + $0x198] sm:$0xff]  ;;  %v132_v15 = vld [vmem:[#allocation7 + $0x20] sm:$0xff] }
 0x1db   :  { %v1540_v20 = vsel %vm520_vm13, %v1443_v33, 128  ;;  %641 = vmin.xlane.f32.xlu1 %v1530_v16  ;;  %v736_v25 = vshra.s32 %v1534_v18, 16  ;;  %v1147_v40 = vpack.c.bf16 %v133_v17, %v132_v15  ;;  %1146 = vmatprep.subr.bf16.mxu0 %v1145_v13  ;;  %v137_v13 = vld [vmem:[#allocation7 + $0x48] sm:$0xff]  ;;  %v1183_v15 = vpack.c.bf16 %v167_v5, %v166_v62  ;;  %v154_v17 = vld [vmem:[#allocation7 + $0xd0] sm:$0xff] }
 0x1dc   :  { %v600_v21 = vpop.xlane.xlu1 %599  ;;  %557 = vmin.xlane.f32.xlu0 %v1537_v19  ;;  %v568_v22 = vshra.s32 %v1540_v20, 16  ;;  %v539_v5 = vand.u32 65535, %v1492_v59  ;;  %v469_v59 = vand.u32 65535, %v1508_v4  ;;  %v157_v4 = vld [vmem:[#allocation7 + $0xe8] sm:$0xff] }
 0x1dd   :  { %vm604_vm14 = vcmp.eq.f32.partialorder %v1434_v31, %v600_v21  ;;  %v432_v23 = vpop.xlane.xlu0 %431  ;;  %v1561_v30 = vcvt.s32.f32 %v736_v25  ;;  %v1173_v21 = vpack.c.bf16 %v179_v14, %v178_v9  ;;  %v150_v25 = vld [vmem:[#allocation7 + $0xb0] sm:$0xff]  ;;  %1148 = vmatpush3.bf16.msra.mxu0 %v1147_v40  ;;  %v136_v9 = vld [vmem:[#allocation7 + $0x40] sm:$0xff]  ;;  %v185_v14 = vld [vmem:[#allocation7 + $0x1c8] sm:$0xff] }
 0x1de   :  { %v1550_v26 = vsel %vm604_vm14, %v1443_v33, 128  ;;  %vm436_vm15 = vcmp.eq.f32.partialorder %v1438_v32, %v432_v23  ;;  %v1553_v27 = vcvt.s32.f32 %v568_v22  ;;  %v162_v22 = vld [vmem:[#allocation7 + $0x110] sm:$0xff]  ;;  %v163_v23 = vld [vmem:[#allocation7 + $0x118] sm:$0xff] }
 0x1df   :  { %v1556_v28 = vsel %vm436_vm15, %v1443_v33, 128  ;;  %725 = vmin.xlane.f32.xlu1 %v1546_v24  ;;  %v652_v31 = vshra.s32 %v1550_v26, 16  ;;  %1174 = vmatprep.subr.bf16.mxu1 %v1173_v21  ;;  %v155_v21 = vld [vmem:[#allocation7 + $0xd8] sm:$0xff] }
 0x1e0   :  { %571 = vmin.xlane.f32.xlu0 %v1553_v27  ;;  %v484_v29 = vshra.s32 %v1556_v28, 16 }
 0x1e1   :  { %v1568_v32 = vcvt.s32.f32 %v652_v31  ;;  %v151_v31 = vld [vmem:[#allocation7 + $0xb8] sm:$0xff] }
 0x1e2   :  { %v1564_v34 = vcvt.s32.f32 %v484_v29  ;;  %v1175_v29 = vpack.c.bf16 %v163_v23, %v162_v22  ;;  %v1149_v46 = vpack.c.bf16 %v151_v31, %v150_v25  ;;  %v1185_v22 = vpack.c.bf16 %v185_v14, %v184_v6  ;;  %v168_v23 = vld [vmem:[#allocation7 + $0x140] sm:$0xff]  ;;  %v169_v25 = vld [vmem:[#allocation7 + $0x148] sm:$0xff] }
 0x1e3   :  { %739 = vmin.xlane.f32.xlu1 %v1561_v30  ;;  %v1157_v31 = vpack.c.bf16 %v155_v21, %v154_v17  ;;  %v1187_v40 = vpack.c.bf16 %v169_v25, %v168_v23  ;;  %v707_v6 = vand.u32 65535, %v1486_v57  ;;  %v637_v57 = vand.u32 65535, %v1502_v2  ;;  %v156_v17 = vld [vmem:[#allocation7 + $0xe0] sm:$0xff]  ;;  %v186_v21 = vld [vmem:[#allocation7 + $0x1d0] sm:$0xff]  ;;  %v187_v25 = vld [vmem:[#allocation7 + $0x1d8] sm:$0xff] }
 0x1e4   :  { %487 = vmin.xlane.f32.xlu0 %v1564_v34  ;;  %1176 = vmatpush3.bf16.msra.mxu1 %v1175_v29  ;;  %v1155_v29 = vpack.c.bf16 %v137_v13, %v136_v9 }
 0x1e5   :  { %1178 = vmatprep.subr.bf16.mxu1 %v1177_v41  ;;  %1150 = vmatprep.subr.bf16.mxu0 %v1149_v46  ;;  %v1159_v41 = vpack.c.bf16 %v139_v39, %v138_v35  ;;  %v609_v46 = vand.u32 65535, %v1457_v43  ;;  %v1189_v35 = vpack.c.bf16 %v187_v25, %v186_v21  ;;  %v170_v39 = vld [vmem:[#allocation7 + $0x150] sm:$0xff] }
 0x1e6   :  { %1152 = vmatpush3.bf16.msra.mxu0 %v1151_v1 }
 0x1e7   :  { %655 = vmin.xlane.f32.xlu1 %v1568_v32  ;;  %1154 = vmatprep.subr.bf16.mxu0 %v1153_v7  ;;  %v611_v60 = vcvt.s32.f32 %v609_v46  ;;  %v639_v46 = vcvt.s32.f32 %v637_v57 }
 0x1e8   :  { %1180 = vmatpush3.bf16.msra.mxu1 %v1179_v53  ;;  %v693_v53 = vand.u32 65535, %v1461_v44  ;;  %v623_v44 = vand.u32 65535, %v1472_v50 }
 0x1e9   :  { %1182 = vmatprep.subr.bf16.mxu1 %v1181_v61 }
 0x1ea   :  { %1156 = vmatpush3.bf16.msra.mxu0 %v1155_v29  ;;  %v695_v62 = vcvt.s32.f32 %v693_v53  ;;  %v625_v7 = vcvt.s32.f32 %v623_v44  ;;  %v140_v29 = vld [vmem:[#allocation7 + $0x60] sm:$0xff] }
 0x1eb   :  { %1158 = vmatprep.subr.bf16.mxu0 %v1157_v31  ;;  %v141_v31 = vld [vmem:[#allocation7 + $0x68] sm:$0xff]  ;;  %v188_v53 = vld [vmem:[#allocation7 + $0x1e0] sm:$0xff] }
 0x1ec   :  { %1184 = vmatpush3.bf16.msra.mxu1 %v1183_v15  ;;  %v709_v15 = vcvt.s32.f32 %v707_v6 }
 0x1ed   :  { %1186 = vmatprep.subr.bf16.mxu1 %v1185_v22  ;;  %v553_v22 = vand.u32 65535, %v1524_v12  ;;  %v1163_v12 = vpack.c.bf16 %v141_v31, %v140_v29 }
 0x1ee   :  { %1160 = vmatpush3.bf16.msra.mxu0 %v1159_v41 }
 0x1f0   :  { %1188 = vmatpush3.bf16.msra.mxu1 %v1187_v40  ;;  %v171_v40 = vld [vmem:[#allocation7 + $0x158] sm:$0xff] }
 0x1f1   :  { %v1191_v38 = vpack.c.bf16 %v171_v40, %v170_v39  ;;  %1190 = vmatprep.subr.bf16.mxu1 %v1189_v35 }
 0x1f4   :  { %1192 = vmatpush3.bf16.msra.mxu1 %v1191_v38 }
 0x254   :  { %v1574_v47 = vpop.xlane.xlu0 %445 }
 0x255   :  { %vm447_vm0 = vcmp.eq.f32.partialorder %v1453_v42, %v1574_v47 }
 0x256   :  { %v448_v52 = vsel %vm447_vm0, %v443_v0, inf  ;;  %v158_v0 = vld [vmem:[#allocation7 + $0xf0] sm:$0xff] }
 0x257   :  { %449 = vmin.xlane.f32.xlu0 %v448_v52  ;;  %v159_v52 = vld [vmem:[#allocation7 + $0xf8] sm:$0xff] }
 0x258   :  { %v1579_v54 = vpop.xlane.xlu1 %613  ;;  %v1581_v56 = vpop.xlane.xlu0 %529 }
 0x259   :  { %vm615_vm1 = vcmp.eq.f32.partialorder %v1466_v48, %v1579_v54  ;;  %vm531_vm2 = vcmp.eq.f32.partialorder %v1468_v49, %v1581_v56  ;;  %v457_v48 = vcvt.s32.f32 %v455_v37  ;;  %v1165_v37 = vpack.c.bf16 %v159_v52, %v158_v0 }
 0x25a   :  { %v616_v43 = vsel %vm615_vm1, %v611_v60, inf  ;;  %v532_v42 = vsel %vm531_vm2, %v527_v36, inf  ;;  %v555_v36 = vcvt.s32.f32 %v553_v22  ;;  %v536_v35 = vcvt.f32.s32 %v1581_v56 }
 0x25b   :  { %617 = vmin.xlane.f32.xlu1 %v616_v43  ;;  %533 = vmin.xlane.f32.xlu0 %v532_v42  ;;  %v142_v43 = vld [vmem:[#allocation7 + $0x70] sm:$0xff]  ;;  %v143_v42 = vld [vmem:[#allocation7 + $0x78] sm:$0xff] }
 0x25c   :  { %v1589_v61 = vpop.xlane.xlu1 %697  ;;  %v537_v38 = vshll.u32 %v536_v35, 16 }
 0x25d   :  { %v1592_v1 = vpop.xlane.xlu0 %459  ;;  %vm699_vm3 = vcmp.eq.f32.partialorder %v1482_v55, %v1589_v61  ;;  %v541_v55 = vcvt.s32.f32 %v539_v5  ;;  %v172_v5 = vld [vmem:[#allocation7 + $0x160] sm:$0xff] }
 0x25e   :  { %v700_v51 = vsel %vm699_vm3, %v695_v62, inf  ;;  %vm461_vm4 = vcmp.eq.f32.partialorder %v1489_v58, %v1592_v1  ;;  %v1193_v62 = vpack.c.bf16 %v189_v10, %v188_v53 }
 0x25f   :  { %701 = vmin.xlane.f32.xlu1 %v700_v51  ;;  %v462_v49 = vsel %vm461_vm4, %v457_v48, inf  ;;  %v173_v48 = vld [vmem:[#allocation7 + $0x168] sm:$0xff]  ;;  %v1167_v51 = vpack.c.bf16 %v143_v42, %v142_v43  ;;  %v1313_v43 = vmov 1.0  }
 0x260   :  { %v1599_v50 = vpop.xlane.xlu1 %627  ;;  %463 = vmin.xlane.f32.xlu0 %v462_v49  ;;  %v1195_v49 = vpack.c.bf16 %v173_v48, %v172_v5  ;;  %1194 = vmatprep.subr.bf16.mxu1 %v1193_v62 }
 0x261   :  { %v1602_v9 = vpop.xlane.xlu0 %543  ;;  %vm629_vm5 = vcmp.eq.f32.partialorder %v1498_v63, %v1599_v50  ;;  %v471_v63 = vcvt.s32.f32 %v469_v59  ;;  %v190_v59 = vld [vmem:[#allocation7 + $0x1f0] sm:$0xff] }
 0x262   :  { %v630_v13 = vsel %vm629_vm5, %v625_v7, inf  ;;  %vm545_vm6 = vcmp.eq.f32.partialorder %v1505_v3, %v1602_v9  ;;  %v1161_v3 = vpack.c.bf16 %v157_v4, %v156_v17  ;;  %v723_v7 = vcvt.s32.f32 %v721_v45  ;;  %1196 = vmatpush3.bf16.msra.mxu1 %v1195_v49 }
 0x263   :  { %631 = vmin.xlane.f32.xlu1 %v630_v13  ;;  %v546_v58 = vsel %vm545_vm6, %v541_v55, inf  ;;  %v191_v55 = vld [vmem:[#allocation7 + $0x1f8] sm:$0xff]  ;;  %v483_v13 = vand.u32 65535, %v1556_v28  ;;  %v651_v28 = vand.u32 65535, %v1550_v26  ;;  %v704_v45 = vcvt.f32.s32 %v1589_v61 }
 0x264   :  { %v1609_v14 = vpop.xlane.xlu1 %711  ;;  %547 = vmin.xlane.f32.xlu0 %v546_v58  ;;  %1162 = vmatprep.subr.bf16.mxu0 %v1161_v3  ;;  %v1197_v57 = vpack.c.bf16 %v191_v55, %v190_v59 }
 0x265   :  { %v1612_v23 = vpop.xlane.xlu0 %473  ;;  %vm713_vm7 = vcmp.eq.f32.partialorder %v1514_v8, %v1609_v14  ;;  %1164 = vmatpush3.bf16.msra.mxu0 %v1163_v12  ;;  %v485_v3 = vcvt.s32.f32 %v483_v13  ;;  %v653_v26 = vcvt.s32.f32 %v651_v28  ;;  %v718_v5 = vcvt.f32.s32 %v1609_v14 }
 0x266   :  { %v714_v2 = vsel %vm713_vm7, %v709_v15, inf  ;;  %vm475_vm8 = vcmp.eq.f32.partialorder %v1521_v11, %v1612_v23  ;;  %v567_v11 = vand.u32 65535, %v1540_v20  ;;  %1166 = vmatprep.subr.bf16.mxu0 %v1165_v37  ;;  %v174_v15 = vld [vmem:[#allocation7 + $0x170] sm:$0xff]  ;;  %1198 = vmatprep.subr.bf16.mxu1 %v1197_v57  ;;  %v480_v55 = vcvt.f32.s32 %v1612_v23 }
 0x267   :  { %715 = vmin.xlane.f32.xlu1 %v714_v2  ;;  %v476_v41 = vsel %vm475_vm8, %v471_v63, inf  ;;  %v452_v2 = vcvt.f32.s32 %v1574_v47  ;;  %v466_v47 = vcvt.f32.s32 %v1592_v1  ;;  %v719_v59 = vshll.u32 %v718_v5, 16 }
 0x268   :  { %v1619_v8 = vpop.xlane.xlu1 %641  ;;  %477 = vmin.xlane.f32.xlu0 %v476_v41  ;;  %v569_v58 = vcvt.s32.f32 %v567_v11 }
 0x269   :  { %v1622_v60 = vpop.xlane.xlu0 %557  ;;  %vm643_vm9 = vcmp.eq.f32.partialorder %v1530_v16, %v1619_v8  ;;  %v735_v16 = vand.u32 65535, %v1534_v18  ;;  %1168 = vmatpush3.bf16.msra.mxu0 %v1167_v51  ;;  %v175_v18 = vld [vmem:[#allocation7 + $0x178] sm:$0xff]  ;;  %v453_v40 = vshll.u32 %v452_v2, 16  ;;  %v467_v1 = vshll.u32 %v466_v47, 16 }
 0x26a   :  { %v644_v44 = vsel %vm643_vm9, %v639_v46, inf  ;;  %vm559_vm10 = vcmp.eq.f32.partialorder %v1537_v19, %v1622_v60  ;;  %v1199_v4 = vpack.c.bf16 %v175_v18, %v174_v15 }
 0x26b   :  { %645 = vmin.xlane.f32.xlu1 %v644_v44  ;;  %v560_v20 = vsel %vm559_vm10, %v555_v36, inf  ;;  %v705_v36 = vshll.u32 %v704_v45, 16  ;;  %v634_v44 = vcvt.f32.s32 %v1599_v50 }
 0x26c   :  { %v1629_v6 = vpop.xlane.xlu1 %725  ;;  %561 = vmin.xlane.f32.xlu0 %v560_v20  ;;  %1200 = vmatpush3.bf16.msra.mxu1 %v1199_v4 }
 0x26d   :  { %v1632_v19 = vpop.xlane.xlu0 %571  ;;  %vm727_vm11 = vcmp.eq.f32.partialorder %v1546_v24, %v1629_v6  ;;  %v737_v24 = vcvt.s32.f32 %v735_v16  ;;  %v635_v16 = vshll.u32 %v634_v44, 16  ;;  %v732_v23 = vcvt.f32.s32 %v1629_v6 }
 0x26e   :  { %v728_v17 = vsel %vm727_vm11, %v723_v7, inf  ;;  %vm573_vm12 = vcmp.eq.f32.partialorder %v1553_v27, %v1632_v19  ;;  %v578_v28 = vcvt.f32.s32 %v1632_v19 }
 0x26f   :  { %729 = vmin.xlane.f32.xlu1 %v728_v17  ;;  %v574_v21 = vsel %vm573_vm12, %v569_v58, inf  ;;  %v564_v58 = vcvt.f32.s32 %v1622_v60  ;;  %v648_v17 = vcvt.f32.s32 %v1619_v8  ;;  %v733_v2 = vshll.u32 %v732_v23, 16 }
 0x270   :  { %v1639_v22 = vpop.xlane.xlu1 %739  ;;  %575 = vmin.xlane.f32.xlu0 %v574_v21  ;;  %v481_v21 = vshll.u32 %v480_v55, 16  ;;  %v579_v6 = vshll.u32 %v578_v28, 16 }
 0x271   :  { %v1641_v63 = vpop.xlane.xlu0 %487  ;;  %vm741_vm13 = vcmp.eq.f32.partialorder %v1561_v30, %v1639_v22  ;;  %v649_v8 = vshll.u32 %v648_v17, 16  ;;  %v746_v19 = vcvt.f32.s32 %v1639_v22 }
 0x272   :  { %v742_v25 = vsel %vm741_vm13, %v737_v24, inf  ;;  %vm489_vm14 = vcmp.eq.f32.partialorder %v1564_v34, %v1641_v63  ;;  %v620_v34 = vcvt.f32.s32 %v1579_v54  ;;  %v550_v54 = vcvt.f32.s32 %v1602_v9 }
 0x273   :  { %743 = vmin.xlane.f32.xlu1 %v742_v25  ;;  %v490_v27 = vsel %vm489_vm14, %v485_v3, inf  ;;  %v565_v24 = vshll.u32 %v564_v58, 16  ;;  %v747_v45 = vshll.u32 %v746_v19, 16 }
 0x274   :  { %v1647_v29 = vpop.xlane.xlu1 %655  ;;  %491 = vmin.xlane.f32.xlu0 %v490_v27  ;;  %v621_v53 = vshll.u32 %v620_v34, 16  ;;  %v551_v9 = vshll.u32 %v550_v54, 16 }
 0x275   :  { %vm657_vm15 = vcmp.eq.f32.partialorder %v1568_v32, %v1647_v29  ;;  %v662_v22 = vcvt.f32.s32 %v1647_v29 }
 0x276   :  { %v658_v31 = vsel %vm657_vm15, %v653_v26, inf }
 0x277   :  { %659 = vmin.xlane.f32.xlu1 %v658_v31  ;;  %v663_v29 = vshll.u32 %v662_v22, 16 }
 0x2e4   :  { %v450_v30 = vpop.xlane.xlu0 %449 }
 0x2e5   :  { %v451_v39 = vcvt.f32.s32 %v450_v30 }
 0x2e7   :  { %v454_v0 = vadd.s32 %v453_v40, %v451_v39  ;;  %v494_v39 = vcvt.f32.s32 %v1641_v63 }
 0x2e8   :  { %v618_v41 = vpop.xlane.xlu1 %617  ;;  %v534_v12 = vpop.xlane.xlu0 %533 }
 0x2e9   :  { %v535_v46 = vcvt.f32.s32 %v534_v12  ;;  %v619_v52 = vcvt.f32.s32 %v618_v41  ;;  %vm497_vm1 = vcmp.eq.s32.totalorder %v1443_v33, %v454_v0  ;;  %v495_v63 = vshll.u32 %v494_v39, 16 }
 0x2eb   :  { %v538_v32 = vadd.s32 %v537_v38, %v535_v46  ;;  %v622_v10 = vadd.s32 %v621_v53, %v619_v52 }
 0x2ec   :  { %v702_v11 = vpop.xlane.xlu1 %701 }
 0x2ed   :  { %v703_v37 = vcvt.f32.s32 %v702_v11  ;;  %v464_v56 = vpop.xlane.xlu0 %463  ;;  %vm581_vm0 = vcmp.eq.s32.totalorder %v1443_v33, %v538_v32  ;;  %vm665_vm3 = vcmp.eq.s32.totalorder %v1443_v33, %v622_v10 }
 0x2ee   :  { %969 = vmatprep.mubr.msk.f32.mxu0 %vm581_vm0, %v1313_v43  ;;  %v465_v42 = vcvt.f32.s32 %v464_v56 }
 0x2ef   :  { %v706_v61 = vadd.s32 %v705_v36, %v703_v37  ;;  %970 = vmatmul.mubr.msk.f32.vlgmr.msra.gmra.mrb[8].mxu0 %vm497_vm1, %v1313_v43 }
 0x2f0   :  { %v632_v62 = vpop.xlane.xlu1 %631  ;;  %v468_v49 = vadd.s32 %v467_v1, %v465_v42 }
 0x2f1   :  { %v548_v48 = vpop.xlane.xlu0 %547  ;;  %vm749_vm2 = vcmp.eq.s32.totalorder %v1443_v33, %v706_v61  ;;  %v633_v20 = vcvt.f32.s32 %v632_v62 }
 0x2f2   :  { %v549_v51 = vcvt.f32.s32 %v548_v48  ;;  %977 = vmatprep.mubr.msk.f32.mxu1 %vm749_vm2, %v1313_v43  ;;  %vm498_vm5 = vcmp.eq.s32.totalorder %v1443_v33, %v468_v49 }
 0x2f3   :  { %978 = vmatmul.mubr.msk.f32.vlgmr.msra.gmra.mrb[8].mxu1 %vm665_vm3, %v1313_v43  ;;  %v636_v57 = vadd.s32 %v635_v16, %v633_v20 }
 0x2f4   :  { %v552_v7 = vadd.s32 %v551_v9, %v549_v51  ;;  %v716_v50 = vpop.xlane.xlu1 %715 }
 0x2f5   :  { %v717_v14 = vcvt.f32.s32 %v716_v50  ;;  %v478_v13 = vpop.xlane.xlu0 %477  ;;  %vm666_vm7 = vcmp.eq.s32.totalorder %v1443_v33, %v636_v57 }
 0x2f6   :  { %vm582_vm4 = vcmp.eq.s32.totalorder %v1443_v33, %v552_v7  ;;  %v479_v18 = vcvt.f32.s32 %v478_v13 }
 0x2f7   :  { %v720_v15 = vadd.s32 %v719_v59, %v717_v14  ;;  %971 = vmatprep.mubr.msk.f32.mxu0 %vm582_vm4, %v1313_v43 }
 0x2f8   :  { %v646_v4 = vpop.xlane.xlu1 %645  ;;  %972 = vmatmul.mubr.msk.f32.gmra.mrb[10].mxu0 %vm498_vm5, %v1313_v43  ;;  %v482_v27 = vadd.s32 %v481_v21, %v479_v18 }
 0x2f9   :  { %v562_v60 = vpop.xlane.xlu0 %561  ;;  %vm750_vm6 = vcmp.eq.s32.totalorder %v1443_v33, %v720_v15  ;;  %v647_v3 = vcvt.f32.s32 %v646_v4 }
 0x2fa   :  { %v563_v25 = vcvt.f32.s32 %v562_v60  ;;  %979 = vmatprep.mubr.msk.f32.mxu1 %vm750_vm6, %v1313_v43  ;;  %vm499_vm9 = vcmp.eq.s32.totalorder %v1443_v33, %v482_v27 }
 0x2fb   :  { %980 = vmatmul.mubr.msk.f32.gmra.mrb[10].mxu1 %vm666_vm7, %v1313_v43  ;;  %v650_v40 = vadd.s32 %v649_v8, %v647_v3 }
 0x2fc   :  { %v566_v26 = vadd.s32 %v565_v24, %v563_v25  ;;  %v730_v31 = vpop.xlane.xlu1 %729 }
 0x2fd   :  { %v731_v30 = vcvt.f32.s32 %v730_v31  ;;  %v576_v35 = vpop.xlane.xlu0 %575  ;;  %vm667_vm12 = vcmp.eq.s32.totalorder %v1443_v33, %v650_v40 }
 0x2fe   :  { %v577_v34 = vcvt.f32.s32 %v576_v35  ;;  %vm583_vm8 = vcmp.eq.s32.totalorder %v1443_v33, %v566_v26 }
 0x2ff   :  { %v734_v41 = vadd.s32 %v733_v2, %v731_v30  ;;  %973 = vmatprep.mubr.msk.f32.mxu0 %vm583_vm8, %v1313_v43 }
 0x300   :  { %v580_v12 = vadd.s32 %v579_v6, %v577_v34  ;;  %v744_v38 = vpop.xlane.xlu1 %743  ;;  %974 = vmatmul.mubr.msk.f32.gmra.mrb[12].mxu0 %vm499_vm9, %v1313_v43 }
 0x301   :  { %v745_v46 = vcvt.f32.s32 %v744_v38  ;;  %v492_v0 = vpop.xlane.xlu0 %491  ;;  %vm751_vm10 = vcmp.eq.s32.totalorder %v1443_v33, %v734_v41 }
 0x302   :  { %v493_v52 = vcvt.f32.s32 %v492_v0  ;;  %981 = vmatprep.mubr.msk.f32.mxu1 %vm751_vm10, %v1313_v43  ;;  %vm584_vm11 = vcmp.eq.s32.totalorder %v1443_v33, %v580_v12 }
 0x303   :  { %v748_v32 = vadd.s32 %v747_v45, %v745_v46  ;;  %975 = vmatprep.mubr.msk.f32.mxu0 %vm584_vm11, %v1313_v43  ;;  %982 = vmatmul.mubr.msk.f32.gmra.mrb[12].mxu1 %vm667_vm12, %v1313_v43 }
 0x304   :  { %v496_v53 = vadd.s32 %v495_v63, %v493_v52  ;;  %v660_v11 = vpop.xlane.xlu1 %659 }
 0x305   :  { %v661_v36 = vcvt.f32.s32 %v660_v11  ;;  %vm752_vm13 = vcmp.eq.s32.totalorder %v1443_v33, %v748_v32 }
 0x306   :  { %983 = vmatprep.mubr.msk.f32.mxu1 %vm752_vm13, %v1313_v43  ;;  %vm500_vm14 = vcmp.eq.s32.totalorder %v1443_v33, %v496_v53 }
 0x307   :  { %v664_v47 = vadd.s32 %v663_v29, %v661_v36  ;;  %976 = vmatmul.mubr.msk.f32.gmra.mrb[14].mxu0 %vm500_vm14, %v1313_v43 }
 0x309   :  { %vm668_vm15 = vcmp.eq.s32.totalorder %v1443_v33, %v664_v47 }
 0x30a   :  { %984 = vmatmul.mubr.msk.f32.gmra.mrb[14].mxu1 %vm668_vm15, %v1313_v43 }
 0x3c2   :  { %v1017_v37 = vpop.f32.mrb[8].mxu0 }
 0x3c3   :  { %v1018_v56 = vpop.f32.mrb[9].mxu0 }
 0x3c4   :  { %v1019_v54 = vadd.f32 %v1018_v56, %v1017_v37 }
 0x3c6   :  { %v1061_v10 = vpop.f32.mrb[8].mxu1 }
 0x3c7   :  { %v1062_v61 = vpop.f32.mrb[9].mxu1 }
 0x3c8   :  { %v1063_v42 = vadd.f32 %v1062_v61, %v1061_v10 }
 0x3ca   :  { %v913_v44 = vadd.f32 %v1063_v42, %v1019_v54 }
 0x3cb   :  { %v1020_v62 = vpop.f32.mrb[10].mxu0 }
 0x3cc   :  { %931 = vst [vmem:[#allocation8] sm:$0xff] %v913_v44  ;;  %v1021_v1 = vpop.f32.mrb[11].mxu0 }
 0x3cd   :  { %v1022_v5 = vadd.f32 %v1021_v1, %v1020_v62 }
 0x3ce   :  { %v1064_v48 = vpop.f32.mrb[10].mxu1 }
 0x3cf   :  { %v1065_v9 = vpop.f32.mrb[11].mxu1 }
 0x3d0   :  { %v1066_v20 = vadd.f32 %v1065_v9, %v1064_v48 }
 0x3d2   :  { %v918_v51 = vadd.f32 %v1066_v20, %v1022_v5 }
 0x3d3   :  { %v1023_v49 = vpop.f32.mrb[12].mxu0 }
 0x3d4   :  { %932 = vst [vmem:[#allocation8 + $0x8] sm:$0xff] %v918_v51  ;;  %v1024_v33 = vpop.f32.mrb[13].mxu0 }
 0x3d5   :  { %v1025_v16 = vadd.f32 %v1024_v33, %v1023_v49 }
 0x3d6   :  { %v1067_v43 = vpop.f32.mrb[12].mxu1 }
 0x3d7   :  { %v1068_v7 = vpop.f32.mrb[13].mxu1 }
 0x3d8   :  { %v1069_v50 = vadd.f32 %v1068_v7, %v1067_v43 }
 0x3da   :  { %v923_v59 = vadd.f32 %v1069_v50, %v1025_v16  ;;  %v1026_v55 = vpop.f32.mrb[14].mxu0 }
 0x3db   :  { %v1027_v14 = vpop.f32.mrb[15].mxu0 }
 0x3dc   :  { %933 = vst [vmem:[#allocation8 + $0x10] sm:$0xff] %v923_v59  ;;  %v1028_v13 = vadd.f32 %v1027_v14, %v1026_v55 }
 0x3dd   :  { %v1070_v58 = vpop.f32.mrb[14].mxu1 }
 0x3de   :  { %v1071_v57 = vpop.f32.mrb[15].mxu1 }
 0x3df   :  { %v1072_v15 = vadd.f32 %v1071_v57, %v1070_v58 }
 0x3e1   :  { %v928_v18 = vadd.f32 %v1072_v15, %v1028_v13 }
 0x3e3   :  { %934 = vst [vmem:[#allocation8 + $0x18] sm:$0xff] %v928_v18 }
 0x3e4   :  { %1288 = shalt.err (!%p1285_p0)
}
 0x3e5   :  { %s1289_s6 = scalar_lea.hbm %s1718_s4, 512 }
 0x3e6   :  { %p1290_p1 = scmp.ne.s32.totalorder %s1718_s4, %s1289_s6  ;;  %p1293_p2 = scmp.lt.u32.totalorder %s1289_s6, %s1718_s4 }
 0x3e8   :  { %p1295_p3 = pnand %p1293_p2, %p1290_p1 }
 0x3ea   :  { %1298 = shalt.err (!%p1295_p3)
}
 0x3eb   :  { %946 = dma.vmem_to_hbm [thread:$0]  %s941_s28, 512, %s1718_s4, [#allocation4], %s1309_s1, %s1309_s1, %s1310_s13  }
 0x3ec   :  { %1303 = dma.done.wait [#allocation4], 512  }
 0x3ed   :  { %1304 = vsyncadd [#allocation4], 4294966784 }
 0x3ee   :  { %950 = vsyncpa [#allocation3], 1 }
 0x3ef   :  { %951 = vsyncpa [#allocation6], 1 }
 0x3f0   :  { %952 = vsyncpa [#allocation4], 1 }

</bundles_post_ra>
